<compile_context>
chip_gen: v6e
topology: v6e:2x2x1
jax: 0.10.0
libtpu: 0.0.40
codegen_flags: <defaults>
</compile_context>

<pallas_src>
import jax
import jax.numpy as jnp
from jax.experimental import pallas as pl
from jax.experimental.pallas import tpu as pltpu


# -----------------------------------------------------------------------------
# Kernel: fused input projection + LSTM recurrence + final dense.
# -----------------------------------------------------------------------------
def nyse_lstm_kernel(x_ref, wih_ref, whh_ref, b_ref, wd_ref, bd_ref, out_ref):
    """Shapes (float32):
      x_ref   : (TB, T*I)   batch tile of the input sequence, flattened (t, i)
      wih_ref : (I, 4*H)    W_ih^T, gate order [i, f, g, o]
      whh_ref : (H, 4*H)    W_hh^T
      b_ref   : (1, 4*H)    b_ih + b_hh
      wd_ref  : (1, H)      dense weight row
      bd_ref  : (1,)        dense bias (SMEM scalar)
      out_ref : (1, TB)     lane-dense output row (batch on lanes)
    """
    TB = x_ref.shape[0]
    H, G = whh_ref.shape                     # H=32, G=4*H=128 (one vreg of lanes)
    I = wih_ref.shape[0]
    T = x_ref.shape[1] // I

    # Weights / bias loaded into vregs once, reused across the whole recurrence.
    wih = wih_ref[...]                       # (I, G)
    whh = whh_ref[...]                       # (H, G)
    b = b_ref[...]                           # (1, G)
    x_all = x_ref[...]                       # (TB, T*I)

    h = jnp.zeros((TB, H), jnp.float32)
    c = jnp.zeros((TB, H), jnp.float32)

    # T is small and static -> unrolled Python loop (switch to fori_loop if T grows).
    for t in range(T):
        x_t = x_all[:, t * I:(t + 1) * I]    # (TB, I) static lane slice
        # Input projection (independent of h, overlaps the recurrence) +
        # one recurrent MXU push per step (K=H=32).  For large H/TB cast the
        # dot operands to bf16 and keep preferred_element_type=float32.
        gates = (jnp.dot(x_t, wih, preferred_element_type=jnp.float32)
                 + jnp.dot(h, whh, preferred_element_type=jnp.float32)
                 + b)                        # (TB, G)

        # One EUP sigmoid pass over all 128 packed gate lanes, then static
        # in-vreg lane slices for the individual gates.
        sg = jax.nn.sigmoid(gates)
        i_g = sg[:, 0 * H:1 * H]
        f_g = sg[:, 1 * H:2 * H]
        o_g = sg[:, 3 * H:4 * H]
        g_g = jnp.tanh(gates[:, 2 * H:3 * H])

        c = f_g * c + i_g * g_g              # (TB, H) f32 cell state
        h = o_g * jnp.tanh(c)

    # Dropout(0.1) in eval mode == identity.
    # Final dense(H -> 1): VPU multiply + lane reduction (skip the tiny MXU op),
    # emitted as a lane-dense (1, TB) row so the store is not a masked column.
    y = jnp.sum(h * wd_ref[...], axis=-1) + bd_ref[0]       # (TB,)
    out_ref[...] = y[None, :].astype(out_ref.dtype)          # (1, TB)


# -----------------------------------------------------------------------------
# Wrapper
# -----------------------------------------------------------------------------
def nyse_lstm_forward(x, params, tb=None):
    """x: (B, T, I) float32.  Returns (B,) float32 — same as torch.flatten(val)."""
    wih_p, whh_p, b_p, wd_p, bd = params
    B, T, I = x.shape
    H, G = whh_p.shape

    if tb is None:
        # Small B: single tile.  Production B: 256 fills the v6e/v7x MXU and
        # gives >=2 grid steps so both v7x TensorCores are used (use 128 on v5e).
        tb = B if B <= 256 else 256
    assert B % tb == 0, "batch must be divisible by the batch tile"

    # Free bitcast: flatten (T, I) so the per-batch-tile block is a 2-D,
    # lane-dense slab (no per-timestep padded tiles, no gx HBM round trip).
    x2 = x.reshape(B, T * I)

    grid = (B // tb,)
    out = pl.pallas_call(
        nyse_lstm_kernel,
        out_shape=jax.ShapeDtypeStruct((1, B), jnp.float32),
        grid_spec=pltpu.PrefetchScalarGridSpec(
            num_scalar_prefetch=0,
            grid=grid,
            in_specs=[
                pl.BlockSpec((tb, T * I), lambda i: (i, 0)),   # per-batch tile
                pl.BlockSpec((I, G), lambda i: (0, 0)),        # W_ih^T (replicated)
                pl.BlockSpec((H, G), lambda i: (0, 0)),        # W_hh^T (replicated)
                pl.BlockSpec((1, G), lambda i: (0, 0)),        # fused bias
                pl.BlockSpec((1, H), lambda i: (0, 0)),        # dense weight
                pl.BlockSpec(memory_space=pltpu.MemorySpace.SMEM),  # dense bias scalar
            ],
            out_specs=pl.BlockSpec((1, tb), lambda i: (0, i)),  # lane-dense row
        ),
        compiler_params=pltpu.CompilerParams(
            dimension_semantics=("parallel",)),
    )(x2, wih_p, whh_p, b_p, wd_p, bd)
    return out.reshape(B)


# -----------------------------------------------------------------------------
# Parameters (PyTorch layout), packing (transposes only, no padding), reference
# -----------------------------------------------------------------------------
def init_raw_params(key, input_size, hidden_size):
    """PyTorch-layout params, U(-1/sqrt(H), 1/sqrt(H)) like nn.LSTM / nn.Linear."""
    k = 1.0 / jnp.sqrt(jnp.float32(hidden_size))
    keys = jax.random.split(key, 6)
    w_ih = jax.random.uniform(keys[0], (4 * hidden_size, input_size), jnp.float32, -k, k)
    w_hh = jax.random.uniform(keys[1], (4 * hidden_size, hidden_size), jnp.float32, -k, k)
    b_ih = jax.random.uniform(keys[2], (4 * hidden_size,), jnp.float32, -k, k)
    b_hh = jax.random.uniform(keys[3], (4 * hidden_size,), jnp.float32, -k, k)
    w_d = jax.random.uniform(keys[4], (1, hidden_size), jnp.float32, -k, k)
    b_d = jax.random.uniform(keys[5], (1,), jnp.float32, -k, k)
    return (w_ih, w_hh, b_ih, b_hh, w_d, b_d)


def pack_params(raw):
    """Pre-transpose and fold biases; no lane padding (4*H = 128 already lane-dense)."""
    w_ih, w_hh, b_ih, b_hh, w_d, b_d = raw
    wih_p = w_ih.T                                  # (I, 4*H)
    whh_p = w_hh.T                                  # (H, 4*H)
    b_p = (b_ih + b_hh).reshape(1, -1)              # (1, 4*H)
    wd_p = w_d                                      # (1, H)
    bd = b_d.reshape(1)                             # (1,) SMEM scalar
    return (wih_p, whh_p, b_p, wd_p, bd)


def reference_forward(x, raw):
    """Pure-JAX reference using the raw (PyTorch-layout) params."""
    w_ih, w_hh, b_ih, b_hh, w_d, b_d = raw
    B, T, _ = x.shape
    H = w_hh.shape[1]
    h = jnp.zeros((B, H), jnp.float32)
    c = jnp.zeros((B, H), jnp.float32)
    for t in range(T):
        g = x[:, t, :] @ w_ih.T + h @ w_hh.T + b_ih + b_hh
        i_g = jax.nn.sigmoid(g[:, 0 * H:1 * H])
        f_g = jax.nn.sigmoid(g[:, 1 * H:2 * H])
        g_g = jnp.tanh(g[:, 2 * H:3 * H])
        o_g = jax.nn.sigmoid(g[:, 3 * H:4 * H])
        c = f_g * c + i_g * g_g
        h = o_g * jnp.tanh(c)
    return (h @ w_d.T + b_d).reshape(B)


if __name__ == "__main__":
    # NYSE setup: window_size=5, 3 features (DJ_return, log_volume,
    # log_volatility), hidden=32.  Small batch.
    batch, seq_len, input_size, hidden_size = 8, 5, 3, 32

    key = jax.random.PRNGKey(0)
    k_x, k_p = jax.random.split(key)
    x = jax.random.normal(k_x, (batch, seq_len, input_size), jnp.float32)

    raw = init_raw_params(k_p, input_size, hidden_size)
    params = pack_params(raw)

    out = nyse_lstm_forward(x, params)
    out = jax.block_until_ready(out)

    ref = reference_forward(x, raw)
    assert out.shape == (batch,)
    assert jnp.allclose(out, ref, atol=1e-5, rtol=1e-5), (out, ref)

    print("KERNEL_OK")
</pallas_src>

<mosaic_0001>
module attributes {stable_mosaic.version = 11 : i64} {
  func.func @nyse_lstm_kernel(%arg0: i32, %arg1: memref<8x15xf32, #tpu.memory_space<vmem>>, %arg2: memref<3x128xf32, #tpu.memory_space<vmem>>, %arg3: memref<32x128xf32, #tpu.memory_space<vmem>>, %arg4: memref<1x128xf32, #tpu.memory_space<vmem>>, %arg5: memref<1x32xf32, #tpu.memory_space<vmem>>, %arg6: memref<1xf32, #tpu.memory_space<smem>>, %arg7: memref<1x8xf32, #tpu.memory_space<vmem>>) attributes {dimension_semantics = [#tpu.dimension_semantics<parallel>], iteration_bounds = array<i64: 1>, scalar_prefetch = 0 : i64, scratch_operands = 0 : i64, tpu.core_type = #tpu.core_type<tc>, window_params = [{transform_indices = @transform_0, window_bounds = array<i64: 8, 15>}, {pipeline_mode = #tpu.pipeline_mode<synchronous>, transform_indices = @transform_1, window_bounds = array<i64: 3, 128>}, {pipeline_mode = #tpu.pipeline_mode<synchronous>, transform_indices = @transform_2, window_bounds = array<i64: 32, 128>}, {pipeline_mode = #tpu.pipeline_mode<synchronous>, transform_indices = @transform_3, window_bounds = array<i64: 1, 128>}, {pipeline_mode = #tpu.pipeline_mode<synchronous>, transform_indices = @transform_4, window_bounds = array<i64: 1, 32>}, {transform_indices = @transform_5, window_bounds = array<i64: 1>}, {transform_indices = @transform_6, window_bounds = array<i64: 1, 8>}]} {
    %c0 = arith.constant 0 : index
    %c0_0 = arith.constant 0 : index
    %0 = vector.load %arg2[%c0, %c0_0] : memref<3x128xf32, #tpu.memory_space<vmem>>, vector<3x128xf32>
    %c0_1 = arith.constant 0 : index
    %c0_2 = arith.constant 0 : index
    %1 = vector.load %arg3[%c0_1, %c0_2] : memref<32x128xf32, #tpu.memory_space<vmem>>, vector<32x128xf32>
    %c0_3 = arith.constant 0 : index
    %c0_4 = arith.constant 0 : index
    %2 = vector.load %arg4[%c0_3, %c0_4] : memref<1x128xf32, #tpu.memory_space<vmem>>, vector<1x128xf32>
    %c0_5 = arith.constant 0 : index
    %c0_6 = arith.constant 0 : index
    %3 = vector.load %arg1[%c0_5, %c0_6] : memref<8x15xf32, #tpu.memory_space<vmem>>, vector<8x15xf32>
    %cst = arith.constant 0.000000e+00 : f32
    %4 = vector.broadcast %cst : f32 to vector<8x32xf32>
    %cst_7 = arith.constant 0.000000e+00 : f32
    %5 = vector.broadcast %cst_7 : f32 to vector<8x32xf32>
    %6 = vector.extract_strided_slice %3 {offsets = [0, 0], sizes = [8, 3], strides = [1, 1]} : vector<8x15xf32> to vector<8x3xf32>
    %cst_8 = arith.constant dense<0.000000e+00> : vector<8x128xf32>
    %7 = tpu.matmul %6, %0, %cst_8 {dimension_numbers = #tpu.dot_dimension_numbers<[1], [0], [0], [1], [0, 0, 1, 1], [], []>} : vector<8x3xf32>, vector<3x128xf32>, vector<8x128xf32> -> vector<8x128xf32>
    %cst_9 = arith.constant dense<0.000000e+00> : vector<8x128xf32>
    %8 = tpu.matmul %4, %1, %cst_9 {dimension_numbers = #tpu.dot_dimension_numbers<[1], [0], [0], [1], [0, 0, 1, 1], [], []>} : vector<8x32xf32>, vector<32x128xf32>, vector<8x128xf32> -> vector<8x128xf32>
    %9 = arith.addf %7, %8 : vector<8x128xf32>
    %10 = vector.broadcast %2 : vector<1x128xf32> to vector<8x128xf32>
    %11 = arith.addf %9, %10 : vector<8x128xf32>
    %12 = arith.negf %11 : vector<8x128xf32>
    %13 = math.exp %12 : vector<8x128xf32>
    %cst_10 = arith.constant 1.000000e+00 : f32
    %14 = vector.broadcast %cst_10 : f32 to vector<8x128xf32>
    %15 = arith.addf %14, %13 : vector<8x128xf32>
    %16 = arith.divf %14, %15 : vector<8x128xf32>
    %17 = vector.extract_strided_slice %16 {offsets = [0, 0], sizes = [8, 32], strides = [1, 1]} : vector<8x128xf32> to vector<8x32xf32>
    %18 = vector.extract_strided_slice %16 {offsets = [0, 32], sizes = [8, 32], strides = [1, 1]} : vector<8x128xf32> to vector<8x32xf32>
    %19 = vector.extract_strided_slice %16 {offsets = [0, 96], sizes = [8, 32], strides = [1, 1]} : vector<8x128xf32> to vector<8x32xf32>
    %20 = vector.extract_strided_slice %11 {offsets = [0, 64], sizes = [8, 32], strides = [1, 1]} : vector<8x128xf32> to vector<8x32xf32>
    %21 = math.tanh %20 : vector<8x32xf32>
    %22 = arith.mulf %18, %5 : vector<8x32xf32>
    %23 = arith.mulf %17, %21 : vector<8x32xf32>
    %24 = arith.addf %22, %23 : vector<8x32xf32>
    %25 = math.tanh %24 : vector<8x32xf32>
    %26 = arith.mulf %19, %25 : vector<8x32xf32>
    %27 = vector.extract_strided_slice %3 {offsets = [0, 3], sizes = [8, 3], strides = [1, 1]} : vector<8x15xf32> to vector<8x3xf32>
    %cst_11 = arith.constant dense<0.000000e+00> : vector<8x128xf32>
    %28 = tpu.matmul %27, %0, %cst_11 {dimension_numbers = #tpu.dot_dimension_numbers<[1], [0], [0], [1], [0, 0, 1, 1], [], []>} : vector<8x3xf32>, vector<3x128xf32>, vector<8x128xf32> -> vector<8x128xf32>
    %cst_12 = arith.constant dense<0.000000e+00> : vector<8x128xf32>
    %29 = tpu.matmul %26, %1, %cst_12 {dimension_numbers = #tpu.dot_dimension_numbers<[1], [0], [0], [1], [0, 0, 1, 1], [], []>} : vector<8x32xf32>, vector<32x128xf32>, vector<8x128xf32> -> vector<8x128xf32>
    %30 = arith.addf %28, %29 : vector<8x128xf32>
    %31 = vector.broadcast %2 : vector<1x128xf32> to vector<8x128xf32>
    %32 = arith.addf %30, %31 : vector<8x128xf32>
    %33 = arith.negf %32 : vector<8x128xf32>
    %34 = math.exp %33 : vector<8x128xf32>
    %cst_13 = arith.constant 1.000000e+00 : f32
    %35 = vector.broadcast %cst_13 : f32 to vector<8x128xf32>
    %36 = arith.addf %35, %34 : vector<8x128xf32>
    %37 = arith.divf %35, %36 : vector<8x128xf32>
    %38 = vector.extract_strided_slice %37 {offsets = [0, 0], sizes = [8, 32], strides = [1, 1]} : vector<8x128xf32> to vector<8x32xf32>
    %39 = vector.extract_strided_slice %37 {offsets = [0, 32], sizes = [8, 32], strides = [1, 1]} : vector<8x128xf32> to vector<8x32xf32>
    %40 = vector.extract_strided_slice %37 {offsets = [0, 96], sizes = [8, 32], strides = [1, 1]} : vector<8x128xf32> to vector<8x32xf32>
    %41 = vector.extract_strided_slice %32 {offsets = [0, 64], sizes = [8, 32], strides = [1, 1]} : vector<8x128xf32> to vector<8x32xf32>
    %42 = math.tanh %41 : vector<8x32xf32>
    %43 = arith.mulf %39, %24 : vector<8x32xf32>
    %44 = arith.mulf %38, %42 : vector<8x32xf32>
    %45 = arith.addf %43, %44 : vector<8x32xf32>
    %46 = math.tanh %45 : vector<8x32xf32>
    %47 = arith.mulf %40, %46 : vector<8x32xf32>
    %48 = vector.extract_strided_slice %3 {offsets = [0, 6], sizes = [8, 3], strides = [1, 1]} : vector<8x15xf32> to vector<8x3xf32>
    %cst_14 = arith.constant dense<0.000000e+00> : vector<8x128xf32>
    %49 = tpu.matmul %48, %0, %cst_14 {dimension_numbers = #tpu.dot_dimension_numbers<[1], [0], [0], [1], [0, 0, 1, 1], [], []>} : vector<8x3xf32>, vector<3x128xf32>, vector<8x128xf32> -> vector<8x128xf32>
    %cst_15 = arith.constant dense<0.000000e+00> : vector<8x128xf32>
    %50 = tpu.matmul %47, %1, %cst_15 {dimension_numbers = #tpu.dot_dimension_numbers<[1], [0], [0], [1], [0, 0, 1, 1], [], []>} : vector<8x32xf32>, vector<32x128xf32>, vector<8x128xf32> -> vector<8x128xf32>
    %51 = arith.addf %49, %50 : vector<8x128xf32>
    %52 = vector.broadcast %2 : vector<1x128xf32> to vector<8x128xf32>
    %53 = arith.addf %51, %52 : vector<8x128xf32>
    %54 = arith.negf %53 : vector<8x128xf32>
    %55 = math.exp %54 : vector<8x128xf32>
    %cst_16 = arith.constant 1.000000e+00 : f32
    %56 = vector.broadcast %cst_16 : f32 to vector<8x128xf32>
    %57 = arith.addf %56, %55 : vector<8x128xf32>
    %58 = arith.divf %56, %57 : vector<8x128xf32>
    %59 = vector.extract_strided_slice %58 {offsets = [0, 0], sizes = [8, 32], strides = [1, 1]} : vector<8x128xf32> to vector<8x32xf32>
    %60 = vector.extract_strided_slice %58 {offsets = [0, 32], sizes = [8, 32], strides = [1, 1]} : vector<8x128xf32> to vector<8x32xf32>
    %61 = vector.extract_strided_slice %58 {offsets = [0, 96], sizes = [8, 32], strides = [1, 1]} : vector<8x128xf32> to vector<8x32xf32>
    %62 = vector.extract_strided_slice %53 {offsets = [0, 64], sizes = [8, 32], strides = [1, 1]} : vector<8x128xf32> to vector<8x32xf32>
    %63 = math.tanh %62 : vector<8x32xf32>
    %64 = arith.mulf %60, %45 : vector<8x32xf32>
    %65 = arith.mulf %59, %63 : vector<8x32xf32>
    %66 = arith.addf %64, %65 : vector<8x32xf32>
    %67 = math.tanh %66 : vector<8x32xf32>
    %68 = arith.mulf %61, %67 : vector<8x32xf32>
    %69 = vector.extract_strided_slice %3 {offsets = [0, 9], sizes = [8, 3], strides = [1, 1]} : vector<8x15xf32> to vector<8x3xf32>
    %cst_17 = arith.constant dense<0.000000e+00> : vector<8x128xf32>
    %70 = tpu.matmul %69, %0, %cst_17 {dimension_numbers = #tpu.dot_dimension_numbers<[1], [0], [0], [1], [0, 0, 1, 1], [], []>} : vector<8x3xf32>, vector<3x128xf32>, vector<8x128xf32> -> vector<8x128xf32>
    %cst_18 = arith.constant dense<0.000000e+00> : vector<8x128xf32>
    %71 = tpu.matmul %68, %1, %cst_18 {dimension_numbers = #tpu.dot_dimension_numbers<[1], [0], [0], [1], [0, 0, 1, 1], [], []>} : vector<8x32xf32>, vector<32x128xf32>, vector<8x128xf32> -> vector<8x128xf32>
    %72 = arith.addf %70, %71 : vector<8x128xf32>
    %73 = vector.broadcast %2 : vector<1x128xf32> to vector<8x128xf32>
    %74 = arith.addf %72, %73 : vector<8x128xf32>
    %75 = arith.negf %74 : vector<8x128xf32>
    %76 = math.exp %75 : vector<8x128xf32>
    %cst_19 = arith.constant 1.000000e+00 : f32
    %77 = vector.broadcast %cst_19 : f32 to vector<8x128xf32>
    %78 = arith.addf %77, %76 : vector<8x128xf32>
    %79 = arith.divf %77, %78 : vector<8x128xf32>
    %80 = vector.extract_strided_slice %79 {offsets = [0, 0], sizes = [8, 32], strides = [1, 1]} : vector<8x128xf32> to vector<8x32xf32>
    %81 = vector.extract_strided_slice %79 {offsets = [0, 32], sizes = [8, 32], strides = [1, 1]} : vector<8x128xf32> to vector<8x32xf32>
    %82 = vector.extract_strided_slice %79 {offsets = [0, 96], sizes = [8, 32], strides = [1, 1]} : vector<8x128xf32> to vector<8x32xf32>
    %83 = vector.extract_strided_slice %74 {offsets = [0, 64], sizes = [8, 32], strides = [1, 1]} : vector<8x128xf32> to vector<8x32xf32>
    %84 = math.tanh %83 : vector<8x32xf32>
    %85 = arith.mulf %81, %66 : vector<8x32xf32>
    %86 = arith.mulf %80, %84 : vector<8x32xf32>
    %87 = arith.addf %85, %86 : vector<8x32xf32>
    %88 = math.tanh %87 : vector<8x32xf32>
    %89 = arith.mulf %82, %88 : vector<8x32xf32>
    %90 = vector.extract_strided_slice %3 {offsets = [0, 12], sizes = [8, 3], strides = [1, 1]} : vector<8x15xf32> to vector<8x3xf32>
    %cst_20 = arith.constant dense<0.000000e+00> : vector<8x128xf32>
    %91 = tpu.matmul %90, %0, %cst_20 {dimension_numbers = #tpu.dot_dimension_numbers<[1], [0], [0], [1], [0, 0, 1, 1], [], []>} : vector<8x3xf32>, vector<3x128xf32>, vector<8x128xf32> -> vector<8x128xf32>
    %cst_21 = arith.constant dense<0.000000e+00> : vector<8x128xf32>
    %92 = tpu.matmul %89, %1, %cst_21 {dimension_numbers = #tpu.dot_dimension_numbers<[1], [0], [0], [1], [0, 0, 1, 1], [], []>} : vector<8x32xf32>, vector<32x128xf32>, vector<8x128xf32> -> vector<8x128xf32>
    %93 = arith.addf %91, %92 : vector<8x128xf32>
    %94 = vector.broadcast %2 : vector<1x128xf32> to vector<8x128xf32>
    %95 = arith.addf %93, %94 : vector<8x128xf32>
    %96 = arith.negf %95 : vector<8x128xf32>
    %97 = math.exp %96 : vector<8x128xf32>
    %cst_22 = arith.constant 1.000000e+00 : f32
    %98 = vector.broadcast %cst_22 : f32 to vector<8x128xf32>
    %99 = arith.addf %98, %97 : vector<8x128xf32>
    %100 = arith.divf %98, %99 : vector<8x128xf32>
    %101 = vector.extract_strided_slice %100 {offsets = [0, 0], sizes = [8, 32], strides = [1, 1]} : vector<8x128xf32> to vector<8x32xf32>
    %102 = vector.extract_strided_slice %100 {offsets = [0, 32], sizes = [8, 32], strides = [1, 1]} : vector<8x128xf32> to vector<8x32xf32>
    %103 = vector.extract_strided_slice %100 {offsets = [0, 96], sizes = [8, 32], strides = [1, 1]} : vector<8x128xf32> to vector<8x32xf32>
    %104 = vector.extract_strided_slice %95 {offsets = [0, 64], sizes = [8, 32], strides = [1, 1]} : vector<8x128xf32> to vector<8x32xf32>
    %105 = math.tanh %104 : vector<8x32xf32>
    %106 = arith.mulf %102, %87 : vector<8x32xf32>
    %107 = arith.mulf %101, %105 : vector<8x32xf32>
    %108 = arith.addf %106, %107 : vector<8x32xf32>
    %109 = math.tanh %108 : vector<8x32xf32>
    %110 = arith.mulf %103, %109 : vector<8x32xf32>
    %c0_23 = arith.constant 0 : index
    %c0_24 = arith.constant 0 : index
    %111 = vector.load %arg5[%c0_23, %c0_24] : memref<1x32xf32, #tpu.memory_space<vmem>>, vector<1x32xf32>
    %112 = vector.broadcast %111 : vector<1x32xf32> to vector<8x32xf32>
    %113 = arith.mulf %110, %112 : vector<8x32xf32>
    %cst_25 = arith.constant dense<0.000000e+00> : vector<8xf32>
    %114 = vector.multi_reduction <add>, %113, %cst_25 [1] : vector<8x32xf32> to vector<8xf32>
    %c0_26 = arith.constant 0 : index
    %115 = memref.load %arg6[%c0_26] : memref<1xf32, #tpu.memory_space<smem>>
    %116 = vector.broadcast %115 : f32 to vector<8xf32>
    %117 = arith.addf %114, %116 : vector<8xf32>
    %118 = vector.shape_cast %117 : vector<8xf32> to vector<1x8xf32>
    %c0_27 = arith.constant 0 : index
    %c0_28 = arith.constant 0 : index
    %119 = vector.load %arg7[%c0_27, %c0_28] : memref<1x8xf32, #tpu.memory_space<vmem>>, vector<1x8xf32>
    tpu.vector_store %arg7[%c0_27, %c0_28], %118 {strides = array<i32>} : memref<1x8xf32, #tpu.memory_space<vmem>>, vector<1x8xf32>,
    return
  }
  func.func @transform_0(%arg0: i32) -> (i32, i32) {
    %c0_i32 = arith.constant 0 : i32
    %c0_i32_0 = arith.constant 0 : i32
    return %arg0, %c0_i32 : i32, i32
  }
  func.func @transform_1(%arg0: i32) -> (i32, i32) {
    %c0_i32 = arith.constant 0 : i32
    %c0_i32_0 = arith.constant 0 : i32
    %c0_i32_1 = arith.constant 0 : i32
    return %c0_i32, %c0_i32_0 : i32, i32
  }
  func.func @transform_2(%arg0: i32) -> (i32, i32) {
    %c0_i32 = arith.constant 0 : i32
    %c0_i32_0 = arith.constant 0 : i32
    %c0_i32_1 = arith.constant 0 : i32
    return %c0_i32, %c0_i32_0 : i32, i32
  }
  func.func @transform_3(%arg0: i32) -> (i32, i32) {
    %c0_i32 = arith.constant 0 : i32
    %c0_i32_0 = arith.constant 0 : i32
    %c0_i32_1 = arith.constant 0 : i32
    return %c0_i32, %c0_i32_0 : i32, i32
  }
  func.func @transform_4(%arg0: i32) -> (i32, i32) {
    %c0_i32 = arith.constant 0 : i32
    %c0_i32_0 = arith.constant 0 : i32
    %c0_i32_1 = arith.constant 0 : i32
    return %c0_i32, %c0_i32_0 : i32, i32
  }
  func.func @transform_5(%arg0: i32) -> i32 {
    %c0_i32 = arith.constant 0 : i32
    %c0_i32_0 = arith.constant 0 : i32
    return %c0_i32 : i32
  }
  func.func @transform_6(%arg0: i32) -> (i32, i32) {
    %c0_i32 = arith.constant 0 : i32
    %c0_i32_0 = arith.constant 0 : i32
    return %c0_i32, %arg0 : i32, i32
  }
}

</mosaic_0001>

<bundles_post_ra>
// kernel: tpu_custom_call.1
= control target key start
LH: loop header
LB: loop body
LE: loop exit
PB: predicated region body
PF: predicated region fallthrough
CT: control target
= control target key end

     0   :  { %12 = vsyncpa [#allocation4], 0  ;;  %s1472_s0 = inlined_call_operand.hbm [shape: f32[8,15], index: 0, kind: input, shape index: {}]   ;;  %s1473_s1 = inlined_call_operand.hbm [shape: f32[3,128], index: 1, kind: input, shape index: {}]   ;;  %s1474_s2 = inlined_call_operand.hbm [shape: f32[32,128], index: 2, kind: input, shape index: {}]   ;;  %s1475_s3 = inlined_call_operand.vmem [shape: f32[1,128], index: 3, kind: input, shape index: {}]   ;;  %s1476_s4 = inlined_call_operand.vmem [shape: f32[1,32], index: 4, kind: input, shape index: {}]   ;;  %s1477_s5 = inlined_call_operand.<no memory space> [shape: f32[1], index: 5, kind: input, shape index: {}]   ;;  %s1478_s6 = inlined_call_operand.hbm [shape: f32[1,8], index: 6, kind: output, shape index: {}]  }
   0x1   :  { %13 = vsyncpa [#allocation7], 0 }
   0x2   :  { %14 = vsyncpa [#allocation5], 0  ;;  %s1271_s21 = smov [#allocation6]   ;;  %s1272_s23 = smov [#allocation3]  }
   0x3   :  { %s31_s22 = sshll.u32 %s1271_s21, 4  ;;  %s21_s24 = sshll.u32 %s1272_s23, 4  ;;  %s32_s22 = int_to_ptr.vmem [resolvable:$true] %s31_s22  ;;  %s22_s24 = int_to_ptr.vmem [resolvable:$true] %s21_s24 }
   0x4   :  { %s1193_s25 = scalar_lea.vmem %s32_s22, 64  ;;  %p1198_p1 = scmp.lt.s32.totalorder %s32_s22, %s32_s22 }
   0x5   :  { %p1194_p0 = scmp.ne.s32.totalorder %s32_s22, %s1193_s25  ;;  %p1199_p2 = scmp.lt.s32.totalorder %s1193_s25, %s1193_s25 }
   0x7   :  { %p1200_p3 = por %p1199_p2, %p1198_p1 }
   0x9   :  { %p1201_p4 = pnand %p1200_p3, %p1194_p0 }
   0xb   :  { %1204 = shalt.err (!%p1201_p4)
}
   0xc   :  { %34 = dma.hbm_to_vmem [thread:$0]  %s1473_s1, 64, %s32_s22, [#allocation7]  }
   0xd   :  { %s1213_s28 = scalar_lea.vmem %s22_s24, 128  ;;  %p1218_p6 = scmp.lt.s32.totalorder %s22_s24, %s22_s24 }
   0xe   :  { %p1214_p5 = scmp.ne.s32.totalorder %s22_s24, %s1213_s28  ;;  %p1219_p7 = scmp.lt.s32.totalorder %s1213_s28, %s1213_s28 }
  0x10   :  { %p1220_p8 = por %p1219_p7, %p1218_p6 }
  0x12   :  { %p1221_p9 = pnand %p1220_p8, %p1214_p5 }
  0x14   :  { %1224 = shalt.err (!%p1221_p9)
}
  0x15   :  { %24 = dma.hbm_to_vmem [thread:$0]  %s1472_s0, 128, %s22_s24, [#allocation4]  }
  0x16   :  { %s1273_s7 = smov [#allocation8]  }
  0x17   :  { %s40_s8 = sshll.u32 %s1273_s7, 4  ;;  %s41_s8 = int_to_ptr.vmem [resolvable:$true] %s40_s8 }
  0x18   :  { %s1233_s9 = scalar_lea.vmem %s41_s8, 512  ;;  %p1238_p11 = scmp.lt.s32.totalorder %s41_s8, %s41_s8 }
  0x19   :  { %p1234_p10 = scmp.ne.s32.totalorder %s41_s8, %s1233_s9  ;;  %p1239_p12 = scmp.lt.s32.totalorder %s1233_s9, %s1233_s9 }
  0x1b   :  { %p1240_p13 = por %p1239_p12, %p1238_p11 }
  0x1d   :  { %p1241_p0 = pnand %p1240_p13, %p1234_p10 }
  0x1f   :  { %1244 = shalt.err (!%p1241_p0)
}
  0x20   :  { %s1274_s1 = smov 128   ;;  %s1275_s10 = smov 8  }
  0x21   :  { %46 = dma.hbm_to_vmem [thread:$0]  %s1474_s2, 512, %s41_s8, [#allocation7], %s1274_s1, %s1274_s1, %s1275_s10  }
  0x22   :  { %1265 = dma.done.wait [#allocation4], 128  }
  0x23   :  { %1266 = vsyncadd [#allocation4], 4294967168 }
  0x24   :  { %1267 = dma.done.wait [#allocation7], 576  }
  0x25   :  { %1268 = vsyncadd [#allocation7], 4294966720  ;;  %v1276_v0 = vmov 0.0   ;;  %vm1277_vm0 = vmmov 0   ;;  %vm147_vm1 = vcmask 1042432   ;;  %v1336_v1 = vld [vmem:[#allocation8 + $0x18] sm:$0xff] }
  0x26   :  { %1050 = vmatprep.subr.mxu0 %v1276_v0  ;;  %1061 = vmatprep.subr.mxu1 %v1276_v0  ;;  %v1338_v2 = vld [vmem:[#allocation8 + $0x10] sm:$0xff]  ;;  %vm143_vm2 = vcmask 23552   ;;  %v1341_v3 = vld [vmem:[#allocation6] sm:$0x7]  ;;  %v1346_v5 = vld [vmem:[#allocation8 + $0x8] sm:$0xff]  ;;  %s1278_s13 = smov 64  }
  0x27   :  { %1063 = vmatprep.mubr.msk.f32.mxu1 %vm1277_vm0, %v1276_v0  ;;  %1058 = vmatprep.mubr.msk.f32.mxu0 %vm1277_vm0, %v1276_v0  ;;  %v1343_v4 = vld [vmem:[#allocation3] sm:$0xff]  ;;  %v1354_v6 = vld [vmem:[#allocation8] sm:$0xff]  ;;  %s1280_s14 = smov 125   ;;  %vm69_vm3 = vcmask 261120   ;;  %s1281_s15 = smov 122   ;;  %vm976_vm4 = vcmask 57344  }
  0x28   :  { %1051 = vmatpush3.msra.mxu0 %v1336_v1  ;;  %1062 = vmatpush3.msk.msra.mxu1 %vm147_vm1, %v1341_v3  ;;  %v1380_v9 = vld [vmem:[%s1475_s3] ss:$0 sm:$0xff]  ;;  %s1279_s3 = smov 32   ;;  %s1282_s16 = smov 119  }
  0x29   :  { %1052 = vmatprep.subr.mxu0 %v1276_v0  ;;  %1064 = vmatmul.mubr.msk.f32.vlgmr.msra.gmra.mxu1 %vm143_vm2, %v1343_v4  ;;  %s1283_s17 = smov 116   ;;  %s1284_s20 = smov 96  }
  0x2a   :  { %1053 = vmatpush3.msra.mxu0 %v1338_v2  ;;  %1066 = vmatprep.subr.mxu1 %v1276_v0  ;;  %s1285_s22 = smov [#allocation9]  }
  0x2b   :  { %1054 = vmatprep.subr.mxu0 %v1276_v0  ;;  %1067 = vmatpush3.msra.mxu1 %v1336_v1  ;;  %s984_s23 = sshll.u32 %s1285_s22, 4  ;;  %s985_s23 = int_to_ptr.vmem [resolvable:$true] %s984_s23 }
  0x2c   :  { %1055 = vmatpush3.msra.mxu0 %v1346_v5  ;;  %1068 = vmatprep.subr.mxu1 %v1276_v0  ;;  %s1245_s24 = scalar_lea.vmem %s985_s23, 16  ;;  %s1249_s25 = scalar_lea.vmem %s985_s23, 32 }
  0x2d   :  { %1056 = vmatprep.subr.mxu0 %v1276_v0  ;;  %1069 = vmatpush3.msra.mxu1 %v1338_v2  ;;  %p1246_p1 = scmp.ne.s32.totalorder %s985_s23, %s1245_s24  ;;  %p1250_p2 = scmp.lt.s32.totalorder %s985_s23, %s985_s23 }
  0x2e   :  { %1057 = vmatpush3.msra.mxu0 %v1354_v6  ;;  %1070 = vmatprep.subr.mxu1 %v1276_v0  ;;  %p1251_p3 = scmp.lt.s32.totalorder %s1249_s25, %s1245_s24 }
  0x2f   :  { %1059 = vmatmul.mubr.f32.vlgmr.msra.gmra.mxu0 %v1276_v0  ;;  %1077 = vmatprep.subr.mxu0 %v1276_v0 }
  0x30   :  { %1078 = vmatpush3.msk.msra.mxu0 %vm147_vm1, %v1341_v3  ;;  %1071 = vmatpush3.msra.mxu1 %v1346_v5  ;;  %p1252_p4 = por %p1251_p3, %p1250_p2 }
  0x31   :  { %1079 = vmatprep.mubr.msk.f32.mxu0 %vm1277_vm0, %v1276_v0  ;;  %1072 = vmatprep.subr.mxu1 %v1276_v0 }
  0x32   :  { %1074 = vmatprep.mubr.msk.f32.mxu1 %vm1277_vm0, %v1276_v0  ;;  %1073 = vmatpush3.msra.mxu1 %v1354_v6  ;;  %p1253_p5 = pnand %p1252_p4, %p1246_p1 }
  0x33   :  { %1093 = vmatprep.subr.mxu0 %v1276_v0  ;;  %1082 = vmatprep.subr.mxu1 %v1276_v0 }
  0xe9   :  { %v217_v7 = vpop.f32.mrf.mxu1 }
  0xeb   :  { %v1065_v8 = vpop.f32.mrf.mxu1 }
  0xef   :  { %v139_v10 = vpop.f32.mrf.mxu0 }
  0xf0   :  { %v218_v11 = vadd.f32 %v217_v7, %v139_v10 }
  0xf1   :  { %v1060_v12 = vpop.f32.mrf.mxu0 }
  0xf2   :  { %v227_v13 = vadd.f32 %v1380_v9, %v218_v11 }
  0xf4   :  { %1145 = vtanh.f32 %v227_v13  ;;  %v997_v15 = vmul.f32 -1.442695, %v227_v13 }
  0xf6   :  { %1147 = vpow2.f32 %v997_v15 }
 0x101   :  { %v1146_v14 = vpop.eup %1145 }
 0x102   :  { %237 = vrot.lane.b32.xlu0 %v1146_v14, %s1278_s13 }
 0x103   :  { %v1148_v16 = vpop.eup %1147 }
 0x104   :  { %v231_v17 = vadd.f32 1.0, %v1148_v16 }
 0x106   :  { %1149 = vrcp.f32 %v231_v17 }
 0x113   :  { %v1150_v18 = vpop.eup %1149 }
 0x114   :  { %v235_v21 = vmul.f32 0.0, %v1150_v18 }
 0x174   :  { %v238_v19 = vpop.permute.xlu0 %237 }
 0x175   :  { %v240_v20 = vmul.f32 %v1150_v18, %v238_v19 }
 0x177   :  { %242 = vrot.lane.b32.xlu0 %v240_v20, %s1279_s3 }
 0x17b   :  { %327 = vrot.lane.b32.xlu0 %v1343_v4, %s1280_s14 }
 0x1e9   :  { %v243_v22 = vpop.permute.xlu0 %242 }
 0x1ea   :  { %v245_v23 = vadd.f32 %v243_v22, %v235_v21 }
 0x1ec   :  { %1151 = vtanh.f32 %v245_v23 }
 0x1ed   :  { %v328_v25 = vpop.permute.xlu0 %327 }
 0x1ee   :  { %1080 = vmatmul.mubr.msk.f32.vlgmr.msra.gmra.mxu0 %vm143_vm2, %v328_v25 }
 0x1ef   :  { %1094 = vmatpush3.msk.msra.mxu0 %vm147_vm1, %v1341_v3  ;;  %1095 = vmatprep.mubr.msk.f32.mxu0 %vm1277_vm0, %v1276_v0 }
 0x1f0   :  { %1098 = vmatprep.subr.mxu0 %v1276_v0 }
 0x1f9   :  { %v1152_v24 = vpop.eup %1151 }
 0x1fa   :  { %248 = vrot.lane.b32.xlu1 %v1152_v24, %s1278_s13 }
 0x26c   :  { %v249_v26 = vpop.permute.xlu1 %248 }
 0x26d   :  { %v251_v27 = vmul.f32 %v1150_v18, %v249_v26 }
 0x26f   :  { %253 = vrot.lane.b32.xlu1 %v251_v27, %s1279_s3 }
 0x2ae   :  { %v397_v29 = vpop.f32.mrf.mxu0 }
 0x2b0   :  { %v1081_v30 = vpop.f32.mrf.mxu0 }
 0x2e1   :  { %v254_v28 = vpop.permute.xlu1 %253 }
 0x2e2   :  { %1075 = vmatmul.mubr.msk.f32.vlgmr.msra.gmra.mxu1 %vm69_vm3, %v254_v28 }
 0x2e3   :  { %1083 = vmatpush3.msra.mxu1 %v1336_v1  ;;  %1090 = vmatprep.mubr.msk.f32.mxu1 %vm1277_vm0, %v1276_v0 }
 0x2e4   :  { %1084 = vmatprep.subr.mxu1 %v1276_v0 }
 0x2e5   :  { %1085 = vmatpush3.msra.mxu1 %v1338_v2 }
 0x2e6   :  { %1086 = vmatprep.subr.mxu1 %v1276_v0 }
 0x2e7   :  { %1087 = vmatpush3.msra.mxu1 %v1346_v5 }
 0x2e8   :  { %1088 = vmatprep.subr.mxu1 %v1276_v0 }
 0x2e9   :  { %1089 = vmatpush3.msra.mxu1 %v1354_v6 }
 0x2ea   :  { %1109 = vmatprep.subr.mxu1 %v1276_v0 }
 0x3a2   :  { %v323_v31 = vpop.f32.mrf.mxu1 }
 0x3a3   :  { %v398_v32 = vadd.f32 %v397_v29, %v323_v31 }
 0x3a4   :  { %v1076_v33 = vpop.f32.mrf.mxu1 }
 0x3a5   :  { %v401_v34 = vadd.f32 %v1380_v9, %v398_v32 }
 0x3a7   :  { %1153 = vtanh.f32 %v401_v34  ;;  %v1001_v36 = vmul.f32 -1.442695, %v401_v34 }
 0x3a9   :  { %1155 = vpow2.f32 %v1001_v36 }
 0x3b4   :  { %v1154_v35 = vpop.eup %1153 }
 0x3b5   :  { %411 = vrot.lane.b32.xlu1 %v1154_v35, %s1278_s13 }
 0x3b6   :  { %v1156_v37 = vpop.eup %1155 }
 0x3b7   :  { %v405_v38 = vadd.f32 1.0, %v1156_v37 }
 0x3b9   :  { %1157 = vrcp.f32 %v405_v38 }
 0x3c6   :  { %v1158_v39 = vpop.eup %1157 }
 0x3c7   :  { %v409_v42 = vmul.f32 %v1158_v39, %v245_v23 }
 0x427   :  { %v412_v40 = vpop.permute.xlu1 %411 }
 0x428   :  { %v414_v41 = vmul.f32 %v1158_v39, %v412_v40 }
 0x42a   :  { %416 = vrot.lane.b32.xlu0 %v414_v41, %s1279_s3 }
 0x49c   :  { %v417_v43 = vpop.permute.xlu0 %416 }
 0x49d   :  { %v419_v44 = vadd.f32 %v417_v43, %v409_v42  ;;  %v1014_v42 = vld [vmem:[%s1476_s4] ss:$0 sm:$0xff] }
 0x49f   :  { %1159 = vtanh.f32 %v419_v44 }
 0x4ac   :  { %v1160_v45 = vpop.eup %1159 }
 0x4ad   :  { %422 = vrot.lane.b32.xlu1 %v1160_v45, %s1278_s13 }
 0x4b1   :  { %501 = vrot.lane.b32.xlu1 %v1343_v4, %s1281_s15 }
 0x51f   :  { %v423_v46 = vpop.permute.xlu1 %422 }
 0x520   :  { %v425_v47 = vmul.f32 %v1158_v39, %v423_v46 }
 0x522   :  { %427 = vrot.lane.b32.xlu0 %v425_v47, %s1279_s3 }
 0x523   :  { %v502_v48 = vpop.permute.xlu1 %501 }
 0x524   :  { %1096 = vmatmul.mubr.msk.f32.vlgmr.msra.gmra.mxu0 %vm143_vm2, %v502_v48 }
 0x525   :  { %1099 = vmatpush3.msra.mxu0 %v1336_v1  ;;  %1106 = vmatprep.mubr.msk.f32.mxu0 %vm1277_vm0, %v1276_v0 }
 0x526   :  { %1100 = vmatprep.subr.mxu0 %v1276_v0 }
 0x527   :  { %1101 = vmatpush3.msra.mxu0 %v1338_v2 }
 0x528   :  { %1102 = vmatprep.subr.mxu0 %v1276_v0 }
 0x529   :  { %1103 = vmatpush3.msra.mxu0 %v1346_v5 }
 0x52a   :  { %1104 = vmatprep.subr.mxu0 %v1276_v0 }
 0x52b   :  { %1105 = vmatpush3.msra.mxu0 %v1354_v6 }
 0x52c   :  { %1125 = vmatprep.subr.mxu0 %v1276_v0 }
 0x594   :  { %v428_v49 = vpop.permute.xlu0 %427 }
 0x595   :  { %1091 = vmatmul.mubr.msk.f32.vlgmr.msra.gmra.mxu1 %vm69_vm3, %v428_v49 }
 0x596   :  { %1110 = vmatpush3.msk.msra.mxu1 %vm147_vm1, %v1341_v3  ;;  %1111 = vmatprep.mubr.msk.f32.mxu1 %vm1277_vm0, %v1276_v0 }
 0x597   :  { %1114 = vmatprep.subr.mxu1 %v1276_v0 }
 0x5e4   :  { %v571_v50 = vpop.f32.mrf.mxu0 }
 0x5e6   :  { %v1097_v51 = vpop.f32.mrf.mxu0 }
 0x655   :  { %v497_v52 = vpop.f32.mrf.mxu1 }
 0x656   :  { %v572_v53 = vadd.f32 %v571_v50, %v497_v52  ;;  %v969_v52 = vlaneseq }
 0x657   :  { %v1092_v54 = vpop.f32.mrf.mxu1 }
 0x658   :  { %v575_v55 = vadd.f32 %v1380_v9, %v572_v53  ;;  %v970_v53 = vand.u32 127, %v969_v52  ;;  %v972_v54 = vshrl.u32 %v969_v52, 7 }
 0x65a   :  { %1161 = vtanh.f32 %v575_v55  ;;  %v1005_v57 = vmul.f32 -1.442695, %v575_v55  ;;  %v966_v55 = vstv %s1477_s5 }
 0x65c   :  { %1163 = vpow2.f32 %v1005_v57 }
 0x667   :  { %v1162_v56 = vpop.eup %1161 }
 0x668   :  { %585 = vrot.lane.b32.xlu0 %v1162_v56, %s1278_s13  ;;  %v973_v56 = vsub.s32 %v970_v53, %v972_v54 }
 0x669   :  { %v1164_v58 = vpop.eup %1163 }
 0x66a   :  { %v579_v59 = vadd.f32 1.0, %v1164_v58 }
 0x66c   :  { %1165 = vrcp.f32 %v579_v59 }
 0x679   :  { %v1166_v60 = vpop.eup %1165 }
 0x67a   :  { %v583_v63 = vmul.f32 %v1166_v60, %v419_v44 }
 0x6da   :  { %v586_v61 = vpop.permute.xlu0 %585 }
 0x6db   :  { %v588_v62 = vmul.f32 %v1166_v60, %v586_v61 }
 0x6dd   :  { %590 = vrot.lane.b32.xlu1 %v588_v62, %s1279_s3 }
 0x74f   :  { %v591_v7 = vpop.permute.xlu1 %590 }
 0x750   :  { %v593_v8 = vadd.f32 %v591_v7, %v583_v63 }
 0x752   :  { %1167 = vtanh.f32 %v593_v8 }
 0x75f   :  { %v1168_v10 = vpop.eup %1167 }
 0x760   :  { %596 = vrot.lane.b32.xlu0 %v1168_v10, %s1278_s13 }
 0x764   :  { %675 = vrot.lane.b32.xlu0 %v1343_v4, %s1282_s16 }
 0x7d2   :  { %v597_v11 = vpop.permute.xlu0 %596 }
 0x7d3   :  { %v599_v12 = vmul.f32 %v1166_v60, %v597_v11 }
 0x7d5   :  { %601 = vrot.lane.b32.xlu1 %v599_v12, %s1279_s3 }
 0x7d6   :  { %v676_v13 = vpop.permute.xlu0 %675 }
 0x7d7   :  { %1112 = vmatmul.mubr.msk.f32.vlgmr.msra.gmra.mxu1 %vm143_vm2, %v676_v13 }
 0x7d8   :  { %1115 = vmatpush3.msra.mxu1 %v1336_v1  ;;  %1122 = vmatprep.mubr.msk.f32.mxu1 %vm1277_vm0, %v1276_v0 }
 0x7d9   :  { %1116 = vmatprep.subr.mxu1 %v1276_v0 }
 0x7da   :  { %1117 = vmatpush3.msra.mxu1 %v1338_v2 }
 0x7db   :  { %1118 = vmatprep.subr.mxu1 %v1276_v0 }
 0x7dc   :  { %1119 = vmatpush3.msra.mxu1 %v1346_v5 }
 0x7dd   :  { %1120 = vmatprep.subr.mxu1 %v1276_v0 }
 0x7de   :  { %1121 = vmatpush3.msra.mxu1 %v1354_v6 }
 0x847   :  { %v602_v14 = vpop.permute.xlu1 %601 }
 0x848   :  { %1107 = vmatmul.mubr.msk.f32.vlgmr.msra.gmra.mxu0 %vm69_vm3, %v602_v14 }
 0x849   :  { %1126 = vmatpush3.msk.msra.mxu0 %vm147_vm1, %v1341_v3  ;;  %1127 = vmatprep.mubr.msk.f32.mxu0 %vm1277_vm0, %v1276_v0 }
 0x897   :  { %v745_v1 = vpop.f32.mrf.mxu1 }
 0x899   :  { %v1113_v15 = vpop.f32.mrf.mxu1 }
 0x908   :  { %v671_v2 = vpop.f32.mrf.mxu0 }
 0x909   :  { %v746_v16 = vadd.f32 %v745_v1, %v671_v2 }
 0x90a   :  { %v1108_v17 = vpop.f32.mrf.mxu0 }
 0x90b   :  { %v749_v5 = vadd.f32 %v1380_v9, %v746_v16 }
 0x90d   :  { %1169 = vtanh.f32 %v749_v5  ;;  %v1009_v6 = vmul.f32 -1.442695, %v749_v5 }
 0x90f   :  { %1171 = vpow2.f32 %v1009_v6 }
 0x91a   :  { %v1170_v18 = vpop.eup %1169 }
 0x91b   :  { %759 = vrot.lane.b32.xlu1 %v1170_v18, %s1278_s13 }
 0x91c   :  { %v1172_v19 = vpop.eup %1171 }
 0x91d   :  { %v753_v20 = vadd.f32 1.0, %v1172_v19 }
 0x91f   :  { %1173 = vrcp.f32 %v753_v20 }
 0x92c   :  { %v1174_v3 = vpop.eup %1173 }
 0x92d   :  { %v757_v0 = vmul.f32 %v1174_v3, %v593_v8 }
 0x98d   :  { %v760_v21 = vpop.permute.xlu1 %759 }
 0x98e   :  { %v762_v22 = vmul.f32 %v1174_v3, %v760_v21 }
 0x990   :  { %764 = vrot.lane.b32.xlu0 %v762_v22, %s1279_s3 }
 0xa02   :  { %v765_v23 = vpop.permute.xlu0 %764 }
 0xa03   :  { %v767_v24 = vadd.f32 %v765_v23, %v757_v0 }
 0xa05   :  { %1175 = vtanh.f32 %v767_v24 }
 0xa12   :  { %v1176_v25 = vpop.eup %1175 }
 0xa13   :  { %770 = vrot.lane.b32.xlu1 %v1176_v25, %s1278_s13 }
 0xa17   :  { %849 = vrot.lane.b32.xlu1 %v1343_v4, %s1283_s17 }
 0xa85   :  { %v771_v26 = vpop.permute.xlu1 %770 }
 0xa86   :  { %v773_v27 = vmul.f32 %v1174_v3, %v771_v26 }
 0xa88   :  { %775 = vrot.lane.b32.xlu0 %v773_v27, %s1279_s3 }
 0xa89   :  { %v850_v28 = vpop.permute.xlu1 %849 }
 0xa8a   :  { %1128 = vmatmul.mubr.msk.f32.vlgmr.msra.gmra.mxu0 %vm143_vm2, %v850_v28 }
 0xafa   :  { %v776_v29 = vpop.permute.xlu0 %775 }
 0xafb   :  { %1123 = vmatmul.mubr.msk.f32.vlgmr.msra.gmra.mxu1 %vm69_vm3, %v776_v29 }
 0xb4a   :  { %v919_v30 = vpop.f32.mrf.mxu0 }
 0xb4c   :  { %v1129_v31 = vpop.f32.mrf.mxu0 }
 0xbbb   :  { %v845_v32 = vpop.f32.mrf.mxu1 }
 0xbbc   :  { %v920_v33 = vadd.f32 %v919_v30, %v845_v32 }
 0xbbd   :  { %v1124_v34 = vpop.f32.mrf.mxu1 }
 0xbbe   :  { %v923_v35 = vadd.f32 %v1380_v9, %v920_v33 }
 0xbc0   :  { %1177 = vtanh.f32 %v923_v35  ;;  %v1013_v4 = vmul.f32 -1.442695, %v923_v35 }
 0xbc2   :  { %1179 = vpow2.f32 %v1013_v4 }
 0xbcd   :  { %v1178_v36 = vpop.eup %1177 }
 0xbce   :  { %933 = vrot.lane.b32.xlu0 %v1178_v36, %s1278_s13 }
 0xbcf   :  { %v1180_v37 = vpop.eup %1179 }
 0xbd0   :  { %v927_v38 = vadd.f32 1.0, %v1180_v37 }
 0xbd2   :  { %1181 = vrcp.f32 %v927_v38 }
 0xbdf   :  { %v1182_v39 = vpop.eup %1181 }
 0xbe0   :  { %v931_v9 = vmul.f32 %v1182_v39, %v767_v24 }
 0xc40   :  { %v934_v40 = vpop.permute.xlu0 %933 }
 0xc41   :  { %v936_v41 = vmul.f32 %v1182_v39, %v934_v40 }
 0xc43   :  { %938 = vrot.lane.b32.xlu1 %v936_v41, %s1279_s3 }
 0xc47   :  { %954 = vrot.lane.b32.xlu1 %v1014_v42, %s1284_s20 }
 0xcb5   :  { %v939_v43 = vpop.permute.xlu1 %938 }
 0xcb6   :  { %v941_v44 = vadd.f32 %v939_v43, %v931_v9 }
 0xcb8   :  { %1183 = vtanh.f32 %v941_v44 }
 0xcb9   :  { %v955_v47 = vpop.permute.xlu1 %954 }
 0xcc5   :  { %v1184_v45 = vpop.eup %1183 }
 0xcc6   :  { %944 = vrot.lane.b32.xlu0 %v1184_v45, %s1278_s13 }
 0xd38   :  { %v945_v46 = vpop.permute.xlu0 %944 }
 0xd39   :  { %v947_v48 = vmul.f32 %v1182_v39, %v945_v46 }
 0xd3b   :  { %v957_v49 = vmul.f32 %v955_v47, %v947_v48 }
 0xd3d   :  { %959 = vrot.lane.b32.xlu0 %v957_v49, %s1279_s3 }
 0xdaf   :  { %v960_v50 = vpop.permute.xlu0 %959 }
 0xdb0   :  { %v962_v51 = vsel %vm69_vm3, %v960_v50, 0.0 }
 0xdb1   :  { %963 = vadd.xlane.f32.xlu1 %v962_v51 }
 0xe3a   :  { %v964_v57 = vpop.xlane.xlu1 %963 }
 0xe3b   :  { %v967_v58 = vadd.f32 %v966_v55, %v964_v57 }
 0xe3d   :  { %v974_v59 = vrot.slane %v967_v58, %v973_v56 }
 0xe3f   :  { %977 = vst.msk [vmem:[#allocation9] sm:$0x1] %vm976_vm4, %v974_v59 }
 0xe40   :  { %1256 = shalt.err (!%p1253_p5)
}
 0xe41   :  { %987 = dma.vmem_to_hbm [thread:$0]  %s985_s23, 16, %s1478_s6, [#allocation5]  }
 0xe42   :  { %1269 = dma.done.wait [#allocation5], 16  }
 0xe43   :  { %1270 = vsyncadd [#allocation5], 4294967280 }
 0xe44   :  { %991 = vsyncpa [#allocation4], 1 }
 0xe45   :  { %992 = vsyncpa [#allocation7], 1 }
 0xe46   :  { %993 = vsyncpa [#allocation5], 1 }

</bundles_post_ra>
